<compile_context>
chip_gen: v7x
topology: tpu7x:2x2x1
jax: 0.10.0
libtpu: 0.0.40
codegen_flags: <defaults>
</compile_context>

<pallas_src>
import math
import jax
import jax.numpy as jnp
from jax.experimental import pallas as pl
from jax.experimental.pallas import tpu as pltpu

LANE = 128
SUBLANE = 8


def _round_up(v, m):
    return ((v + m - 1) // m) * m


def gcn_kernel(x_ref, batch_ref,
               w1_ref, b1_ref, w2_ref, b2_ref, w3_ref, b3_ref,
               wo_ref, bo_ref,
               out_ref,
               pooled_acc, count_acc):
    t = pl.program_id(0)

    @pl.when(t == 0)
    def _init():
        pooled_acc[...] = jnp.zeros_like(pooled_acc)
        count_acc[...] = jnp.zeros_like(count_acc)

    # --- three Linear + ReLU layers on this node tile (MXU, f32 accumulation) ---
    x = x_ref[...]
    h = jnp.dot(x, w1_ref[...], preferred_element_type=jnp.float32) + b1_ref[...]
    h = jnp.maximum(h, 0.0)
    h = jnp.dot(h.astype(w2_ref.dtype), w2_ref[...],
                preferred_element_type=jnp.float32) + b2_ref[...]
    h = jnp.maximum(h, 0.0)
    h = jnp.dot(h.astype(w3_ref.dtype), w3_ref[...],
                preferred_element_type=jnp.float32) + b3_ref[...]
    h = jnp.maximum(h, 0.0)

    # --- global_mean_pool accumulation: per-tile one-hot segment-sum on the MXU ---
    B = pooled_acc.shape[0]
    TM = x.shape[0]
    batch = batch_ref[...]                                      # (1, TM) int32 graph ids
    gids = jax.lax.broadcasted_iota(jnp.int32, (B, TM), 0)      # (B, TM)
    mask = (gids == batch).astype(jnp.float32)                  # (B, TM) one-hot
    pooled_acc[...] += jnp.dot(mask, h, preferred_element_type=jnp.float32)
    count_acc[...] += jnp.sum(mask, axis=1, keepdims=True)

    # --- finalize once: mean, (eval) dropout, output Linear, log_softmax ---
    @pl.when(t == pl.num_programs(0) - 1)
    def _finalize():
        counts = jnp.maximum(count_acc[...], 1.0)               # empty graph -> 0, not NaN
        pooled = pooled_acc[...] / counts
        # TODO(synk): F.dropout(p=0.5, training=True) not reproduced (eval-mode identity).
        logits = jnp.dot(pooled, wo_ref[...].astype(jnp.float32),
                         preferred_element_type=jnp.float32) + bo_ref[...]
        m = jnp.max(logits, axis=1, keepdims=True)
        shifted = logits - m
        lse = jnp.log(jnp.sum(jnp.exp(shifted), axis=1, keepdims=True))
        out_ref[...] = shifted - lse


def init_params(key, input_channels, hidden_inputs, output_channels):
    """PyTorch-Linear-style init: U(-1/sqrt(fan_in), 1/sqrt(fan_in)); W stored [in, out]."""
    def linear(k, fan_in, fan_out):
        kw, kb = jax.random.split(k)
        bound = 1.0 / math.sqrt(fan_in)
        w = jax.random.uniform(kw, (fan_in, fan_out), jnp.float32, -bound, bound)
        b = jax.random.uniform(kb, (1, fan_out), jnp.float32, -bound, bound)
        return w, b

    k1, k2, k3, k4 = jax.random.split(key, 4)
    w1, b1 = linear(k1, input_channels, hidden_inputs)
    w2, b2 = linear(k2, hidden_inputs, hidden_inputs)
    w3, b3 = linear(k3, hidden_inputs, hidden_inputs)
    wo, bo = linear(k4, hidden_inputs, output_channels)
    return dict(w1=w1, b1=b1, w2=w2, b2=b2, w3=w3, b3=b3, wo=wo, bo=bo)


def custom_gcn_forward(x, batch, params, num_graphs, *,
                       tile_nodes=512, compute_dtype=jnp.float32):
    assert tile_nodes % LANE == 0, "tile_nodes must be a multiple of 128"
    N, F = x.shape
    H = params["w1"].shape[1]
    C = params["wo"].shape[1]

    F_p = _round_up(F, LANE)
    H_p = _round_up(H, LANE)
    C_p = _round_up(C, LANE)
    B_p = _round_up(num_graphs, SUBLANE)
    TM = tile_nodes if N > tile_nodes else _round_up(N, SUBLANE)
    N_p = _round_up(N, TM)
    n_tiles = N_p // TM

    # ---- wrapper-side zero padding to lane-dense shapes (results stay exact) ----
    xp = jnp.zeros((N_p, F_p), compute_dtype).at[:N, :F].set(x.astype(compute_dtype))
    # padded node rows get an out-of-range graph id -> contribute nothing to the pool
    bt = jnp.full((1, N_p), B_p, jnp.int32).at[0, :N].set(batch.astype(jnp.int32))

    def pad_w(w, r, c):
        return jnp.zeros((r, c), compute_dtype).at[:w.shape[0], :w.shape[1]].set(
            w.astype(compute_dtype))

    def pad_b(b, c, fill=0.0):
        return jnp.full((1, c), fill, jnp.float32).at[:, :b.shape[1]].set(
            b.astype(jnp.float32))

    w1 = pad_w(params["w1"], F_p, H_p); b1 = pad_b(params["b1"], H_p)
    w2 = pad_w(params["w2"], H_p, H_p); b2 = pad_b(params["b2"], H_p)
    w3 = pad_w(params["w3"], H_p, H_p); b3 = pad_b(params["b3"], H_p)
    # padded class columns get bias -1e30 so they vanish under log_softmax
    wo = pad_w(params["wo"], H_p, C_p); bo = pad_b(params["bo"], C_p, fill=-1e30)

    resident = lambda t: (0, 0)
    itemsize = jnp.dtype(compute_dtype).itemsize
    flops = 2 * N_p * (F_p * H_p + 2 * H_p * H_p + B_p * H_p) + 2 * B_p * H_p * C_p
    bytes_accessed = (xp.size * itemsize + bt.size * 4
                      + (w1.size + w2.size + w3.size + wo.size) * itemsize
                      + (b1.size + b2.size + b3.size + bo.size) * 4
                      + B_p * C_p * 4)

    fn = pl.pallas_call(
        gcn_kernel,
        out_shape=jax.ShapeDtypeStruct((B_p, C_p), jnp.float32),
        grid_spec=pltpu.PrefetchScalarGridSpec(
            num_scalar_prefetch=0,
            grid=(n_tiles,),
            in_specs=[
                pl.BlockSpec((TM, F_p), lambda t: (t, 0)),    # streamed node tile
                pl.BlockSpec((1, TM), lambda t: (0, t)),      # graph ids for this tile
                pl.BlockSpec((F_p, H_p), resident),
                pl.BlockSpec((1, H_p), resident),
                pl.BlockSpec((H_p, H_p), resident),
                pl.BlockSpec((1, H_p), resident),
                pl.BlockSpec((H_p, H_p), resident),
                pl.BlockSpec((1, H_p), resident),
                pl.BlockSpec((H_p, C_p), resident),
                pl.BlockSpec((1, C_p), resident),
            ],
            out_specs=pl.BlockSpec((B_p, C_p), resident),     # VMEM-resident output
            scratch_shapes=[
                pltpu.VMEM((B_p, H_p), jnp.float32),          # pooled per-graph sums
                pltpu.VMEM((B_p, 1), jnp.float32),            # per-graph node counts
            ],
        ),
        compiler_params=pltpu.CompilerParams(
            dimension_semantics=("arbitrary",),               # node-tile axis is a reduction
        ),
        cost_estimate=pl.CostEstimate(flops=flops, transcendentals=B_p * C_p,
                                      bytes_accessed=bytes_accessed),
    )
    out_p = fn(xp, bt, w1, b1, w2, b2, w3, b3, wo, bo)
    return out_p[:num_graphs, :C]


def reference_forward(x, batch, params, num_graphs):
    h = jnp.maximum(x @ params["w1"] + params["b1"], 0.0)
    h = jnp.maximum(h @ params["w2"] + params["b2"], 0.0)
    h = jnp.maximum(h @ params["w3"] + params["b3"], 0.0)
    one_hot = (jnp.arange(num_graphs)[:, None] == batch[None, :]).astype(jnp.float32)
    counts = jnp.maximum(one_hot.sum(axis=1, keepdims=True), 1.0)
    pooled = (one_hot @ h) / counts
    logits = pooled @ params["wo"] + params["bo"]
    return jax.nn.log_softmax(logits, axis=1)


if __name__ == "__main__":
    key = jax.random.PRNGKey(0)
    kx, kp, kx2 = jax.random.split(key, 3)

    F_IN, HID, C_OUT = 16, 32, 8
    params = init_params(kp, F_IN, HID, C_OUT)

    # --- small case (single node tile) ---
    N, B = 32, 4
    x = jax.random.normal(kx, (N, F_IN), dtype=jnp.float32)
    batch = jnp.repeat(jnp.arange(B, dtype=jnp.int32), N // B)
    out = jax.block_until_ready(custom_gcn_forward(x, batch, params, num_graphs=B))
    ref = reference_forward(x, batch, params, B)
    assert out.shape == (B, C_OUT)
    assert jnp.allclose(jnp.sum(jnp.exp(out), axis=1), 1.0, atol=1e-4)
    assert jnp.allclose(out, ref, atol=1e-3, rtol=1e-3), float(jnp.max(jnp.abs(out - ref)))

    # --- multi-tile case (grid over node tiles; last tile partially padded) ---
    N2, B2 = 320, 4
    x2 = jax.random.normal(kx2, (N2, F_IN), dtype=jnp.float32)
    batch2 = jnp.repeat(jnp.arange(B2, dtype=jnp.int32), N2 // B2)
    out2 = jax.block_until_ready(
        custom_gcn_forward(x2, batch2, params, num_graphs=B2, tile_nodes=128))
    ref2 = reference_forward(x2, batch2, params, B2)
    assert out2.shape == (B2, C_OUT)
    assert jnp.allclose(out2, ref2, atol=1e-3, rtol=1e-3), float(jnp.max(jnp.abs(out2 - ref2)))

    # --- bf16-streaming variant (v6e/v7x HBM-traffic optimization), loose tolerance ---
    out_bf16 = jax.block_until_ready(
        custom_gcn_forward(x2, batch2, params, num_graphs=B2,
                           tile_nodes=128, compute_dtype=jnp.bfloat16))
    assert jnp.allclose(jnp.sum(jnp.exp(out_bf16), axis=1), 1.0, atol=1e-3)
    assert jnp.allclose(out_bf16, ref2, atol=0.15, rtol=0.1)

    print("KERNEL_OK")
</pallas_src>

<mosaic_0001>
module attributes {stable_mosaic.version = 11 : i64} {
  func.func @gcn_kernel(%arg0: i32, %arg1: memref<32x128xf32, #tpu.memory_space<vmem>>, %arg2: memref<1x32xi32, #tpu.memory_space<vmem>>, %arg3: memref<128x128xf32, #tpu.memory_space<vmem>>, %arg4: memref<1x128xf32, #tpu.memory_space<vmem>>, %arg5: memref<128x128xf32, #tpu.memory_space<vmem>>, %arg6: memref<1x128xf32, #tpu.memory_space<vmem>>, %arg7: memref<128x128xf32, #tpu.memory_space<vmem>>, %arg8: memref<1x128xf32, #tpu.memory_space<vmem>>, %arg9: memref<128x128xf32, #tpu.memory_space<vmem>>, %arg10: memref<1x128xf32, #tpu.memory_space<vmem>>, %arg11: memref<8x128xf32, #tpu.memory_space<vmem>>, %arg12: memref<8x128xf32, #tpu.memory_space<vmem>>, %arg13: memref<8x1xf32, #tpu.memory_space<vmem>>) attributes {dimension_semantics = [#tpu.dimension_semantics<arbitrary>], iteration_bounds = array<i64: 1>, scalar_prefetch = 0 : i64, scratch_operands = 2 : i64, tpu.core_type = #tpu.core_type<tc>, window_params = [{transform_indices = @transform_0, window_bounds = array<i64: 32, 128>}, {transform_indices = @transform_1, window_bounds = array<i64: 1, 32>}, {pipeline_mode = #tpu.pipeline_mode<synchronous>, transform_indices = @transform_2, window_bounds = array<i64: 128, 128>}, {pipeline_mode = #tpu.pipeline_mode<synchronous>, transform_indices = @transform_3, window_bounds = array<i64: 1, 128>}, {pipeline_mode = #tpu.pipeline_mode<synchronous>, transform_indices = @transform_4, window_bounds = array<i64: 128, 128>}, {pipeline_mode = #tpu.pipeline_mode<synchronous>, transform_indices = @transform_5, window_bounds = array<i64: 1, 128>}, {pipeline_mode = #tpu.pipeline_mode<synchronous>, transform_indices = @transform_6, window_bounds = array<i64: 128, 128>}, {pipeline_mode = #tpu.pipeline_mode<synchronous>, transform_indices = @transform_7, window_bounds = array<i64: 1, 128>}, {pipeline_mode = #tpu.pipeline_mode<synchronous>, transform_indices = @transform_8, window_bounds = array<i64: 128, 128>}, {pipeline_mode = #tpu.pipeline_mode<synchronous>, transform_indices = @transform_9, window_bounds = array<i64: 1, 128>}, {pipeline_mode = #tpu.pipeline_mode<synchronous>, transform_indices = @transform_10, window_bounds = array<i64: 8, 128>}]} {
    %c0_i32 = arith.constant 0 : i32
    %0 = arith.cmpi eq, %arg0, %c0_i32 : i32
    %1 = arith.extui %0 : i1 to i32
    %c0_i32_0 = arith.constant 0 : i32
    %2 = arith.cmpi ne, %1, %c0_i32_0 : i32
    scf.if %2 {
      %cst_33 = arith.constant 0.000000e+00 : f32
      %43 = vector.broadcast %cst_33 : f32 to vector<8x128xf32>
      %c0_34 = arith.constant 0 : index
      %c0_35 = arith.constant 0 : index
      %44 = vector.load %arg12[%c0_34, %c0_35] : memref<8x128xf32, #tpu.memory_space<vmem>>, vector<8x128xf32>
      tpu.vector_store %arg12[%c0_34, %c0_35], %43 {strides = array<i32>} : memref<8x128xf32, #tpu.memory_space<vmem>>, vector<8x128xf32>,
      %cst_36 = arith.constant 0.000000e+00 : f32
      %45 = vector.broadcast %cst_36 : f32 to vector<8x1xf32>
      %c0_37 = arith.constant 0 : index
      %c0_38 = arith.constant 0 : index
      %46 = vector.load %arg13[%c0_37, %c0_38] : memref<8x1xf32, #tpu.memory_space<vmem>>, vector<8x1xf32>
      tpu.vector_store %arg13[%c0_37, %c0_38], %45 {strides = array<i32>} : memref<8x1xf32, #tpu.memory_space<vmem>>, vector<8x1xf32>,
    } else {
    }
    %c0 = arith.constant 0 : index
    %c0_1 = arith.constant 0 : index
    %3 = vector.load %arg1[%c0, %c0_1] : memref<32x128xf32, #tpu.memory_space<vmem>>, vector<32x128xf32>
    %c0_2 = arith.constant 0 : index
    %c0_3 = arith.constant 0 : index
    %4 = vector.load %arg3[%c0_2, %c0_3] : memref<128x128xf32, #tpu.memory_space<vmem>>, vector<128x128xf32>
    %cst = arith.constant dense<0.000000e+00> : vector<32x128xf32>
    %5 = tpu.matmul %3, %4, %cst {dimension_numbers = #tpu.dot_dimension_numbers<[1], [0], [0], [1], [0, 0, 1, 1], [], []>} : vector<32x128xf32>, vector<128x128xf32>, vector<32x128xf32> -> vector<32x128xf32>
    %c0_4 = arith.constant 0 : index
    %c0_5 = arith.constant 0 : index
    %6 = vector.load %arg4[%c0_4, %c0_5] : memref<1x128xf32, #tpu.memory_space<vmem>>, vector<1x128xf32>
    %7 = vector.broadcast %6 : vector<1x128xf32> to vector<32x128xf32>
    %8 = arith.addf %5, %7 : vector<32x128xf32>
    %cst_6 = arith.constant 0.000000e+00 : f32
    %9 = vector.broadcast %cst_6 : f32 to vector<32x128xf32>
    %10 = arith.maximumf %8, %9 : vector<32x128xf32>
    %c0_7 = arith.constant 0 : index
    %c0_8 = arith.constant 0 : index
    %11 = vector.load %arg5[%c0_7, %c0_8] : memref<128x128xf32, #tpu.memory_space<vmem>>, vector<128x128xf32>
    %cst_9 = arith.constant dense<0.000000e+00> : vector<32x128xf32>
    %12 = tpu.matmul %10, %11, %cst_9 {dimension_numbers = #tpu.dot_dimension_numbers<[1], [0], [0], [1], [0, 0, 1, 1], [], []>} : vector<32x128xf32>, vector<128x128xf32>, vector<32x128xf32> -> vector<32x128xf32>
    %c0_10 = arith.constant 0 : index
    %c0_11 = arith.constant 0 : index
    %13 = vector.load %arg6[%c0_10, %c0_11] : memref<1x128xf32, #tpu.memory_space<vmem>>, vector<1x128xf32>
    %14 = vector.broadcast %13 : vector<1x128xf32> to vector<32x128xf32>
    %15 = arith.addf %12, %14 : vector<32x128xf32>
    %cst_12 = arith.constant 0.000000e+00 : f32
    %16 = vector.broadcast %cst_12 : f32 to vector<32x128xf32>
    %17 = arith.maximumf %15, %16 : vector<32x128xf32>
    %c0_13 = arith.constant 0 : index
    %c0_14 = arith.constant 0 : index
    %18 = vector.load %arg7[%c0_13, %c0_14] : memref<128x128xf32, #tpu.memory_space<vmem>>, vector<128x128xf32>
    %cst_15 = arith.constant dense<0.000000e+00> : vector<32x128xf32>
    %19 = tpu.matmul %17, %18, %cst_15 {dimension_numbers = #tpu.dot_dimension_numbers<[1], [0], [0], [1], [0, 0, 1, 1], [], []>} : vector<32x128xf32>, vector<128x128xf32>, vector<32x128xf32> -> vector<32x128xf32>
    %c0_16 = arith.constant 0 : index
    %c0_17 = arith.constant 0 : index
    %20 = vector.load %arg8[%c0_16, %c0_17] : memref<1x128xf32, #tpu.memory_space<vmem>>, vector<1x128xf32>
    %21 = vector.broadcast %20 : vector<1x128xf32> to vector<32x128xf32>
    %22 = arith.addf %19, %21 : vector<32x128xf32>
    %cst_18 = arith.constant 0.000000e+00 : f32
    %23 = vector.broadcast %cst_18 : f32 to vector<32x128xf32>
    %24 = arith.maximumf %22, %23 : vector<32x128xf32>
    %c0_19 = arith.constant 0 : index
    %c0_20 = arith.constant 0 : index
    %25 = vector.load %arg2[%c0_19, %c0_20] : memref<1x32xi32, #tpu.memory_space<vmem>>, vector<1x32xi32>
    %26 = tpu.iota {dimensions = array<i32: 0>} : vector<8x32xi32>
    %27 = vector.broadcast %25 : vector<1x32xi32> to vector<8x32xi32>
    %28 = arith.cmpi eq, %26, %27 : vector<8x32xi32>
    %29 = arith.extui %28 : vector<8x32xi1> to vector<8x32xi32>
    %30 = arith.sitofp %29 : vector<8x32xi32> to vector<8x32xf32>
    %c0_21 = arith.constant 0 : index
    %c0_22 = arith.constant 0 : index
    %31 = vector.load %arg12[%c0_21, %c0_22] : memref<8x128xf32, #tpu.memory_space<vmem>>, vector<8x128xf32>
    %cst_23 = arith.constant dense<0.000000e+00> : vector<8x128xf32>
    %32 = tpu.matmul %30, %24, %cst_23 {dimension_numbers = #tpu.dot_dimension_numbers<[1], [0], [0], [1], [0, 0, 1, 1], [], []>} : vector<8x32xf32>, vector<32x128xf32>, vector<8x128xf32> -> vector<8x128xf32>
    %33 = arith.addf %31, %32 : vector<8x128xf32>
    %c0_24 = arith.constant 0 : index
    %c0_25 = arith.constant 0 : index
    %34 = vector.load %arg12[%c0_24, %c0_25] : memref<8x128xf32, #tpu.memory_space<vmem>>, vector<8x128xf32>
    tpu.vector_store %arg12[%c0_24, %c0_25], %33 {strides = array<i32>} : memref<8x128xf32, #tpu.memory_space<vmem>>, vector<8x128xf32>,
    %c0_26 = arith.constant 0 : index
    %c0_27 = arith.constant 0 : index
    %35 = vector.load %arg13[%c0_26, %c0_27] : memref<8x1xf32, #tpu.memory_space<vmem>>, vector<8x1xf32>
    %cst_28 = arith.constant dense<0.000000e+00> : vector<8xf32>
    %36 = vector.multi_reduction <add>, %30, %cst_28 [1] : vector<8x32xf32> to vector<8xf32>
    %37 = vector.shape_cast %36 : vector<8xf32> to vector<8x1xf32>
    %38 = arith.addf %35, %37 : vector<8x1xf32>
    %c0_29 = arith.constant 0 : index
    %c0_30 = arith.constant 0 : index
    %39 = vector.load %arg13[%c0_29, %c0_30] : memref<8x1xf32, #tpu.memory_space<vmem>>, vector<8x1xf32>
    tpu.vector_store %arg13[%c0_29, %c0_30], %38 {strides = array<i32>} : memref<8x1xf32, #tpu.memory_space<vmem>>, vector<8x1xf32>,
    %c0_i32_31 = arith.constant 0 : i32
    %40 = arith.cmpi eq, %arg0, %c0_i32_31 : i32
    %41 = arith.extui %40 : i1 to i32
    %c0_i32_32 = arith.constant 0 : i32
    %42 = arith.cmpi ne, %41, %c0_i32_32 : i32
    scf.if %42 {
      %c0_33 = arith.constant 0 : index
      %c0_34 = arith.constant 0 : index
      %43 = vector.load %arg13[%c0_33, %c0_34] : memref<8x1xf32, #tpu.memory_space<vmem>>, vector<8x1xf32>
      %cst_35 = arith.constant 1.000000e+00 : f32
      %44 = vector.broadcast %cst_35 : f32 to vector<8x1xf32>
      %45 = arith.maximumf %43, %44 : vector<8x1xf32>
      %c0_36 = arith.constant 0 : index
      %c0_37 = arith.constant 0 : index
      %46 = vector.load %arg12[%c0_36, %c0_37] : memref<8x128xf32, #tpu.memory_space<vmem>>, vector<8x128xf32>
      %47 = vector.broadcast %45 : vector<8x1xf32> to vector<8x128xf32>
      %48 = arith.divf %46, %47 : vector<8x128xf32>
      %c0_38 = arith.constant 0 : index
      %c0_39 = arith.constant 0 : index
      %49 = vector.load %arg9[%c0_38, %c0_39] : memref<128x128xf32, #tpu.memory_space<vmem>>, vector<128x128xf32>
      %cst_40 = arith.constant dense<0.000000e+00> : vector<8x128xf32>
      %50 = tpu.matmul %48, %49, %cst_40 {dimension_numbers = #tpu.dot_dimension_numbers<[1], [0], [0], [1], [0, 0, 1, 1], [], []>} : vector<8x128xf32>, vector<128x128xf32>, vector<8x128xf32> -> vector<8x128xf32>
      %c0_41 = arith.constant 0 : index
      %c0_42 = arith.constant 0 : index
      %51 = vector.load %arg10[%c0_41, %c0_42] : memref<1x128xf32, #tpu.memory_space<vmem>>, vector<1x128xf32>
      %52 = vector.broadcast %51 : vector<1x128xf32> to vector<8x128xf32>
      %53 = arith.addf %50, %52 : vector<8x128xf32>
      %cst_43 = arith.constant dense<0xFF800000> : vector<8xf32>
      %54 = vector.multi_reduction <maximumf>, %53, %cst_43 [1] : vector<8x128xf32> to vector<8xf32>
      %55 = vector.shape_cast %54 : vector<8xf32> to vector<8x1xf32>
      %56 = vector.broadcast %55 : vector<8x1xf32> to vector<8x128xf32>
      %57 = arith.subf %53, %56 : vector<8x128xf32>
      %58 = math.exp %57 : vector<8x128xf32>
      %cst_44 = arith.constant dense<0.000000e+00> : vector<8xf32>
      %59 = vector.multi_reduction <add>, %58, %cst_44 [1] : vector<8x128xf32> to vector<8xf32>
      %60 = vector.shape_cast %59 : vector<8xf32> to vector<8x1xf32>
      %61 = math.log %60 : vector<8x1xf32>
      %62 = vector.broadcast %61 : vector<8x1xf32> to vector<8x128xf32>
      %63 = arith.subf %57, %62 : vector<8x128xf32>
      %c0_45 = arith.constant 0 : index
      %c0_46 = arith.constant 0 : index
      %64 = vector.load %arg11[%c0_45, %c0_46] : memref<8x128xf32, #tpu.memory_space<vmem>>, vector<8x128xf32>
      tpu.vector_store %arg11[%c0_45, %c0_46], %63 {strides = array<i32>} : memref<8x128xf32, #tpu.memory_space<vmem>>, vector<8x128xf32>,
    } else {
    }
    return
  }
  func.func @transform_0(%arg0: i32) -> (i32, i32) {
    %c0_i32 = arith.constant 0 : i32
    %c0_i32_0 = arith.constant 0 : i32
    return %arg0, %c0_i32 : i32, i32
  }
  func.func @transform_1(%arg0: i32) -> (i32, i32) {
    %c0_i32 = arith.constant 0 : i32
    %c0_i32_0 = arith.constant 0 : i32
    return %c0_i32, %arg0 : i32, i32
  }
  func.func @transform_2(%arg0: i32) -> (i32, i32) {
    %c0_i32 = arith.constant 0 : i32
    %c0_i32_0 = arith.constant 0 : i32
    %c0_i32_1 = arith.constant 0 : i32
    return %c0_i32, %c0_i32_0 : i32, i32
  }
  func.func @transform_3(%arg0: i32) -> (i32, i32) {
    %c0_i32 = arith.constant 0 : i32
    %c0_i32_0 = arith.constant 0 : i32
    %c0_i32_1 = arith.constant 0 : i32
    return %c0_i32, %c0_i32_0 : i32, i32
  }
  func.func @transform_4(%arg0: i32) -> (i32, i32) {
    %c0_i32 = arith.constant 0 : i32
    %c0_i32_0 = arith.constant 0 : i32
    %c0_i32_1 = arith.constant 0 : i32
    return %c0_i32, %c0_i32_0 : i32, i32
  }
  func.func @transform_5(%arg0: i32) -> (i32, i32) {
    %c0_i32 = arith.constant 0 : i32
    %c0_i32_0 = arith.constant 0 : i32
    %c0_i32_1 = arith.constant 0 : i32
    return %c0_i32, %c0_i32_0 : i32, i32
  }
  func.func @transform_6(%arg0: i32) -> (i32, i32) {
    %c0_i32 = arith.constant 0 : i32
    %c0_i32_0 = arith.constant 0 : i32
    %c0_i32_1 = arith.constant 0 : i32
    return %c0_i32, %c0_i32_0 : i32, i32
  }
  func.func @transform_7(%arg0: i32) -> (i32, i32) {
    %c0_i32 = arith.constant 0 : i32
    %c0_i32_0 = arith.constant 0 : i32
    %c0_i32_1 = arith.constant 0 : i32
    return %c0_i32, %c0_i32_0 : i32, i32
  }
  func.func @transform_8(%arg0: i32) -> (i32, i32) {
    %c0_i32 = arith.constant 0 : i32
    %c0_i32_0 = arith.constant 0 : i32
    %c0_i32_1 = arith.constant 0 : i32
    return %c0_i32, %c0_i32_0 : i32, i32
  }
  func.func @transform_9(%arg0: i32) -> (i32, i32) {
    %c0_i32 = arith.constant 0 : i32
    %c0_i32_0 = arith.constant 0 : i32
    %c0_i32_1 = arith.constant 0 : i32
    return %c0_i32, %c0_i32_0 : i32, i32
  }
  func.func @transform_10(%arg0: i32) -> (i32, i32) {
    %c0_i32 = arith.constant 0 : i32
    %c0_i32_0 = arith.constant 0 : i32
    %c0_i32_1 = arith.constant 0 : i32
    return %c0_i32, %c0_i32_0 : i32, i32
  }
}

</mosaic_0001>

<bundles_post_ra>
// kernel: tpu_custom_call.1
= control target key start
LH: loop header
LB: loop body
LE: loop exit
PB: predicated region body
PF: predicated region fallthrough
CT: control target
= control target key end

     0   :  { %15 = vsyncpa [#allocation5], 0  ;;  %s1416_s0 = inlined_call_operand.hbm [shape: f32[32,128], index: 0, kind: input, shape index: {}]   ;;  %s1417_s1 = inlined_call_operand.vmem [shape: s32[1,32], index: 1, kind: input, shape index: {}]   ;;  %s1418_s2 = inlined_call_operand.hbm [shape: f32[128,128], index: 2, kind: input, shape index: {}]   ;;  %s1419_s3 = inlined_call_operand.vmem [shape: f32[1,128], index: 3, kind: input, shape index: {}]   ;;  %s1420_s4 = inlined_call_operand.hbm [shape: f32[128,128], index: 4, kind: input, shape index: {}]   ;;  %s1421_s5 = inlined_call_operand.vmem [shape: f32[1,128], index: 5, kind: input, shape index: {}]   ;;  %s1422_s6 = inlined_call_operand.hbm [shape: f32[128,128], index: 6, kind: input, shape index: {}]   ;;  %s1423_s7 = inlined_call_operand.vmem [shape: f32[1,128], index: 7, kind: input, shape index: {}]   ;;  %s1424_s8 = inlined_call_operand.hbm [shape: f32[128,128], index: 8, kind: input, shape index: {}]   ;;  %s1425_s9 = inlined_call_operand.vmem [shape: f32[1,128], index: 9, kind: input, shape index: {}]   ;;  %s1426_s10 = inlined_call_operand.hbm [shape: f32[8,128], index: 10, kind: output, shape index: {}]  }
   0x1   :  { %16 = vsyncpa [#allocation8], 0 }
   0x2   :  { %17 = vsyncpa [#allocation11], 0 }
   0x3   :  { %18 = vsyncpa [#allocation6], 0  ;;  %s1213_s13 = smov [#allocation7]   ;;  %s1214_s15 = smov [#allocation10]  }
   0x4   :  { %s38_s14 = sshll.u32 %s1213_s13, 4  ;;  %s66_s16 = sshll.u32 %s1214_s15, 4  ;;  %s39_s14 = int_to_ptr.vmem [resolvable:$true] %s38_s14  ;;  %s1280_s16 = int_to_ptr.vmem [resolvable:$true] %s66_s16 }
   0x5   :  { %s1073_s19 = scalar_lea.hbm %s1418_s2, 2048 }
   0x6   :  { %p1074_p0 = scmp.ne.s32.totalorder %s1418_s2, %s1073_s19  ;;  %p1077_p1 = scmp.lt.u32.totalorder %s1073_s19, %s1418_s2 }
   0x8   :  { %p1079_p2 = pnand %p1077_p1, %p1074_p0 }
   0xa   :  { %1082 = shalt.err (!%p1079_p2)
}
   0xb   :  { %s1083_s24 = scalar_lea.vmem %s39_s14, 2048  ;;  %p1088_p4 = scmp.lt.s32.totalorder %s39_s14, %s39_s14 }
   0xc   :  { %p1084_p3 = scmp.ne.s32.totalorder %s39_s14, %s1083_s24  ;;  %p1089_p5 = scmp.lt.s32.totalorder %s1083_s24, %s1083_s24 }
   0xe   :  { %p1090_p6 = por %p1089_p5, %p1088_p4 }
  0x10   :  { %p1091_p7 = pnand %p1090_p6, %p1084_p3 }
  0x12   :  { %1094 = shalt.err (!%p1091_p7)
}
  0x13   :  { %s1215_s25 = smov 128   ;;  %s1216_s26 = smov 8  }
  0x14   :  { %44 = dma.hbm_to_vmem [thread:$0]  %s1418_s2, 2048, %s39_s14, [#allocation8], %s1215_s25, %s1215_s25, %s1216_s26  }
  0x15   :  { %s1095_s11 = scalar_lea.hbm %s1422_s6, 2048 }
  0x16   :  { %p1096_p8 = scmp.ne.s32.totalorder %s1422_s6, %s1095_s11  ;;  %p1099_p9 = scmp.lt.u32.totalorder %s1095_s11, %s1422_s6 }
  0x18   :  { %p1101_p10 = pnand %p1099_p9, %p1096_p8 }
  0x1a   :  { %1104 = shalt.err (!%p1101_p10)
}
  0x1b   :  { %s1105_s18 = scalar_lea.vmem %s1280_s16, 2048  ;;  %p1110_p12 = scmp.lt.s32.totalorder %s1280_s16, %s1280_s16 }
  0x1c   :  { %p1106_p11 = scmp.ne.s32.totalorder %s1280_s16, %s1105_s18  ;;  %p1111_p13 = scmp.lt.s32.totalorder %s1105_s18, %s1105_s18 }
  0x1e   :  { %p1112_p0 = por %p1111_p13, %p1110_p12 }
  0x20   :  { %p1113_p1 = pnand %p1112_p0, %p1106_p11 }
  0x22   :  { %1116 = shalt.err (!%p1113_p1)
}
  0x23   :  { %72 = dma.hbm_to_vmem [thread:$0]  %s1422_s6, 2048, %s1280_s16, [#allocation11], %s1215_s25, %s1215_s25, %s1216_s26  }
  0x24   :  { %s1217_s19 = smov [#allocation4]   ;;  %s1218_s21 = smov [#allocation9]  }
  0x25   :  { %s24_s20 = sshll.u32 %s1217_s19, 4  ;;  %s52_s22 = sshll.u32 %s1218_s21, 4  ;;  %s25_s20 = int_to_ptr.vmem [resolvable:$true] %s24_s20  ;;  %s1317_s22 = int_to_ptr.vmem [resolvable:$true] %s52_s22 }
  0x26   :  { %s1117_s27 = scalar_lea.hbm %s1416_s0, 512 }
  0x27   :  { %p1118_p2 = scmp.ne.s32.totalorder %s1416_s0, %s1117_s27  ;;  %p1121_p3 = scmp.lt.u32.totalorder %s1117_s27, %s1416_s0 }
  0x29   :  { %p1123_p4 = pnand %p1121_p3, %p1118_p2 }
  0x2b   :  { %1126 = shalt.err (!%p1123_p4)
}
  0x2c   :  { %s1127_s6 = scalar_lea.vmem %s25_s20, 512  ;;  %p1132_p6 = scmp.lt.s32.totalorder %s25_s20, %s25_s20 }
  0x2d   :  { %p1128_p5 = scmp.ne.s32.totalorder %s25_s20, %s1127_s6  ;;  %p1133_p7 = scmp.lt.s32.totalorder %s1127_s6, %s1127_s6 }
  0x2f   :  { %p1134_p8 = por %p1133_p7, %p1132_p6 }
  0x31   :  { %p1135_p9 = pnand %p1134_p8, %p1128_p5 }
  0x33   :  { %1138 = shalt.err (!%p1135_p9)
}
  0x34   :  { %30 = dma.hbm_to_vmem [thread:$0]  %s1416_s0, 512, %s25_s20, [#allocation5], %s1215_s25, %s1215_s25, %s1216_s26  }
  0x35   :  { %s1139_s17 = scalar_lea.hbm %s1420_s4, 2048 }
  0x36   :  { %p1140_p10 = scmp.ne.s32.totalorder %s1420_s4, %s1139_s17  ;;  %p1143_p11 = scmp.lt.u32.totalorder %s1139_s17, %s1420_s4 }
  0x38   :  { %p1145_p12 = pnand %p1143_p11, %p1140_p10 }
  0x3a   :  { %1148 = shalt.err (!%p1145_p12)
}
  0x3b   :  { %s1149_s21 = scalar_lea.vmem %s1317_s22, 2048  ;;  %p1154_p0 = scmp.lt.s32.totalorder %s1317_s22, %s1317_s22 }
  0x3c   :  { %p1150_p13 = scmp.ne.s32.totalorder %s1317_s22, %s1149_s21  ;;  %p1155_p1 = scmp.lt.s32.totalorder %s1149_s21, %s1149_s21 }
  0x3e   :  { %p1156_p2 = por %p1155_p1, %p1154_p0 }
  0x40   :  { %p1157_p3 = pnand %p1156_p2, %p1150_p13 }
  0x42   :  { %1160 = shalt.err (!%p1157_p3)
}
  0x43   :  { %58 = dma.hbm_to_vmem [thread:$0]  %s1420_s4, 2048, %s1317_s22, [#allocation8], %s1215_s25, %s1215_s25, %s1216_s26  }
  0x44   :  { %s1219_s23 = smov [#allocation12]   ;;  %s1161_s29 = scalar_lea.hbm %s1424_s8, 2048 }
  0x45   :  { %s80_s24 = sshll.u32 %s1219_s23, 4  ;;  %p1162_p4 = scmp.ne.s32.totalorder %s1424_s8, %s1161_s29  ;;  %s81_s24 = int_to_ptr.vmem [resolvable:$true] %s80_s24 }
  0x46   :  { %p1165_p5 = scmp.lt.u32.totalorder %s1161_s29, %s1424_s8 }
  0x48   :  { %p1167_p6 = pnand %p1165_p5, %p1162_p4 }
  0x4a   :  { %1170 = shalt.err (!%p1167_p6)
}
  0x4b   :  { %s1171_s12 = scalar_lea.vmem %s81_s24, 2048  ;;  %p1176_p8 = scmp.lt.s32.totalorder %s81_s24, %s81_s24 }
  0x4c   :  { %p1172_p7 = scmp.ne.s32.totalorder %s81_s24, %s1171_s12  ;;  %p1177_p9 = scmp.lt.s32.totalorder %s1171_s12, %s1171_s12 }
  0x4e   :  { %p1178_p10 = por %p1177_p9, %p1176_p8 }
  0x50   :  { %p1179_p11 = pnand %p1178_p10, %p1172_p7 }
  0x52   :  { %1182 = shalt.err (!%p1179_p11)
}
  0x53   :  { %86 = dma.hbm_to_vmem [thread:$0]  %s1424_s8, 2048, %s81_s24, [#allocation11], %s1215_s25, %s1215_s25, %s1216_s26  }
  0x54   :  { %1205 = dma.done.wait [#allocation5], 512  }
  0x55   :  { %1206 = vsyncadd [#allocation5], 4294966784 }
  0x56   :  { %1207 = dma.done.wait [#allocation8], 4096  }
  0x57   :  { %1208 = vsyncadd [#allocation8], 4294963200 }
  0x58   :  { %1209 = dma.done.wait [#allocation11], 4096  }
  0x59   :  { %1210 = vsyncadd [#allocation11], 4294963200  ;;  %v115_v0 = vld [vmem:[#allocation7] sm:$0xff]  ;;  %v116_v1 = vld [vmem:[#allocation7 + $0x8] sm:$0xff]  ;;  %vm109_vm0 = vcmask 7168   ;;  %vm462_vm1 = vcmask 261120  }
  0x5a   :  { %v117_v2 = vld [vmem:[#allocation7 + $0x10] sm:$0xff]  ;;  %v928_v3 = vpack.c.bf16 %v116_v1, %v115_v0  ;;  %v118_v4 = vld [vmem:[#allocation7 + $0x18] sm:$0xff]  ;;  %v119_v6 = vld [vmem:[#allocation7 + $0x20] sm:$0xff]  ;;  %vm1222_vm3 = vmmov 0   ;;  %s1224_s18 = smov [#allocation13]  }
  0x5b   :  { %v932_v5 = vpack.c.bf16 %v118_v4, %v117_v2  ;;  %v120_v7 = vld [vmem:[#allocation7 + $0x28] sm:$0xff]  ;;  %v111_v9 = vld [vmem:[#allocation4] sm:$0xff]  ;;  %v121_v10 = vld [vmem:[#allocation7 + $0x30] sm:$0xff]  ;;  %s668_s2 = sshll.u32 %s1224_s18, 4  ;;  %s669_s2 = int_to_ptr.vmem [resolvable:$true] %s668_s2 }
  0x5c   :  { %929 = vmatprep.subr.bf16.mxu0 %v928_v3  ;;  %v936_v8 = vpack.c.bf16 %v120_v7, %v119_v6  ;;  %v122_v11 = vld [vmem:[#allocation7 + $0x38] sm:$0xff]  ;;  %800 = vmatprep.mubr.f32.mxu0 %v111_v9  ;;  %v227_v12 = vld [vmem:[#allocation9] sm:$0xff]  ;;  %v228_v13 = vld [vmem:[#allocation9 + $0x8] sm:$0xff]  ;;  %p1188_p13 = scmp.lt.s32.totalorder %s669_s2, %s669_s2 }
  0x5d   :  { %931 = vmatpush3.bf16.msra.mxu0 %v928_v3  ;;  %v229_v14 = vld [vmem:[#allocation9 + $0x10] sm:$0xff]  ;;  %v230_v15 = vld [vmem:[#allocation9 + $0x18] sm:$0xff]  ;;  %v960_v16 = vpack.c.bf16 %v228_v13, %v227_v12  ;;  %v940_v18 = vpack.c.bf16 %v122_v11, %v121_v10  ;;  %v231_v19 = vld [vmem:[#allocation9 + $0x20] sm:$0xff] }
  0x5e   :  { %933 = vmatprep.subr.bf16.mxu0 %v932_v5  ;;  %v964_v17 = vpack.c.bf16 %v230_v15, %v229_v14  ;;  %v232_v20 = vld [vmem:[#allocation9 + $0x28] sm:$0xff]  ;;  %v123_v21 = vld [vmem:[#allocation7 + $0x40] sm:$0xff]  ;;  %v233_v25 = vld [vmem:[#allocation9 + $0x30] sm:$0xff] }
  0x5f   :  { %v124_v22 = vld [vmem:[#allocation7 + $0x48] sm:$0xff]  ;;  %961 = vmatprep.subr.bf16.mxu1 %v960_v16  ;;  %v968_v23 = vpack.c.bf16 %v232_v20, %v231_v19  ;;  %v234_v26 = vld [vmem:[#allocation9 + $0x38] sm:$0xff]  ;;  %v125_v27 = vld [vmem:[#allocation7 + $0x50] sm:$0xff] }
  0x60   :  { %963 = vmatpush3.bf16.msra.mxu1 %v960_v16  ;;  %v944_v24 = vpack.c.bf16 %v124_v22, %v123_v21  ;;  %v126_v28 = vld [vmem:[#allocation7 + $0x58] sm:$0xff]  ;;  %v972_v29 = vpack.c.bf16 %v234_v26, %v233_v25  ;;  %v235_v31 = vld [vmem:[#allocation9 + $0x40] sm:$0xff]  ;;  %v236_v32 = vld [vmem:[#allocation9 + $0x48] sm:$0xff]  ;;  %v452_v25 = vlaneseq }
  0x61   :  { %935 = vmatpush3.bf16.msra.mxu0 %v932_v5  ;;  %965 = vmatprep.subr.bf16.mxu1 %v964_v17  ;;  %v948_v30 = vpack.c.bf16 %v126_v28, %v125_v27  ;;  %v127_v33 = vld [vmem:[#allocation7 + $0x60] sm:$0xff]  ;;  %v128_v34 = vld [vmem:[#allocation7 + $0x68] sm:$0xff]  ;;  %v976_v35 = vpack.c.bf16 %v236_v32, %v235_v31  ;;  %v237_v37 = vld [vmem:[#allocation9 + $0x50] sm:$0xff]  ;;  %v1220_v27 = vmov 0.0  }
  0x62   :  { %937 = vmatprep.subr.bf16.mxu0 %v936_v8  ;;  %v952_v36 = vpack.c.bf16 %v128_v34, %v127_v33  ;;  %v238_v38 = vld [vmem:[#allocation9 + $0x58] sm:$0xff]  ;;  %v129_v39 = vld [vmem:[#allocation7 + $0x70] sm:$0xff]  ;;  %v239_v43 = vld [vmem:[#allocation9 + $0x60] sm:$0xff]  ;;  %110 = vst.msk [vmem:[#allocation3] sm:$0xff] %vm109_vm0, %v1220_v27  ;;  %v453_v28 = vshrl.u32 %v452_v25, 7 }
  0x63   :  { %v130_v40 = vld [vmem:[#allocation7 + $0x78] sm:$0xff]  ;;  %v980_v41 = vpack.c.bf16 %v238_v38, %v237_v37  ;;  %v240_v44 = vld [vmem:[#allocation9 + $0x68] sm:$0xff]  ;;  %v113_v47 = vld [vmem:[#allocation4 + $0x10] sm:$0xff] }
  0x64   :  { %967 = vmatpush3.bf16.msra.mxu1 %v964_v17  ;;  %v956_v42 = vpack.c.bf16 %v130_v40, %v129_v39  ;;  %v984_v45 = vpack.c.bf16 %v240_v44, %v239_v43  ;;  %v112_v46 = vld [vmem:[#allocation4 + $0x8] sm:$0xff]  ;;  %v114_v48 = vld [vmem:[#allocation4 + $0x18] sm:$0xff]  ;;  %v241_v49 = vld [vmem:[#allocation9 + $0x70] sm:$0xff]  ;;  %v1221_v44 = vmov 0.0|0.0  }
  0x65   :  { %939 = vmatpush3.bf16.msra.mxu0 %v936_v8  ;;  %969 = vmatprep.subr.bf16.mxu1 %v968_v23  ;;  %v242_v50 = vld [vmem:[#allocation9 + $0x78] sm:$0xff]  ;;  %v339_v52 = vld [vmem:[#allocation10] sm:$0xff]  ;;  %v340_v53 = vld [vmem:[#allocation10 + $0x8] sm:$0xff] }
  0x66   :  { %941 = vmatprep.subr.bf16.mxu0 %v940_v18  ;;  %v988_v51 = vpack.c.bf16 %v242_v50, %v241_v49  ;;  %v341_v54 = vld [vmem:[#allocation10 + $0x10] sm:$0xff]  ;;  %v992_v55 = vpack.c.bf16 %v340_v53, %v339_v52  ;;  %v342_v56 = vld [vmem:[#allocation10 + $0x18] sm:$0xff]  ;;  %v343_v58 = vld [vmem:[#allocation10 + $0x20] sm:$0xff] }
  0x67   :  { %v996_v57 = vpack.c.bf16 %v342_v56, %v341_v54  ;;  %v344_v59 = vld [vmem:[#allocation10 + $0x28] sm:$0xff]  ;;  %v345_v61 = vld [vmem:[#allocation10 + $0x30] sm:$0xff]  ;;  %v346_v62 = vld [vmem:[#allocation10 + $0x38] sm:$0xff] }
  0x68   :  { %971 = vmatpush3.bf16.msra.mxu1 %v968_v23  ;;  %v1000_v60 = vpack.c.bf16 %v344_v59, %v343_v58  ;;  %v1004_v63 = vpack.c.bf16 %v346_v62, %v345_v61  ;;  %v347_v0 = vld [vmem:[#allocation10 + $0x40] sm:$0xff]  ;;  %v348_v1 = vld [vmem:[#allocation10 + $0x48] sm:$0xff]  ;;  %v349_v3 = vld [vmem:[#allocation10 + $0x50] sm:$0xff] }
  0x69   :  { %943 = vmatpush3.bf16.msra.mxu0 %v940_v18  ;;  %973 = vmatprep.subr.bf16.mxu1 %v972_v29  ;;  %v1008_v2 = vpack.c.bf16 %v348_v1, %v347_v0  ;;  %v350_v4 = vld [vmem:[#allocation10 + $0x58] sm:$0xff]  ;;  %v351_v6 = vld [vmem:[#allocation10 + $0x60] sm:$0xff]  ;;  %v352_v7 = vld [vmem:[#allocation10 + $0x68] sm:$0xff] }
  0x6a   :  { %945 = vmatprep.subr.bf16.mxu0 %v944_v24  ;;  %v1012_v5 = vpack.c.bf16 %v350_v4, %v349_v3  ;;  %v1016_v8 = vpack.c.bf16 %v352_v7, %v351_v6  ;;  %v679_v9 = vld [vmem:[%s1419_s3] ss:$0 sm:$0xff]  ;;  %v353_v22 = vld [vmem:[#allocation10 + $0x70] sm:$0xff]  ;;  %v558_v1 = vld [vmem:[#allocation12] sm:$0xff] }
  0x6b   :  { %v354_v23 = vld [vmem:[#allocation10 + $0x78] sm:$0xff] }
  0x6c   :  { %975 = vmatpush3.bf16.msra.mxu1 %v972_v29  ;;  %v682_v26 = vld [vmem:[%s1417_s1] ss:$0 sm:$0xff] }
  0x6d   :  { %947 = vmatpush3.bf16.msra.mxu0 %v944_v24  ;;  %977 = vmatprep.subr.bf16.mxu1 %v976_v35  ;;  %v1020_v24 = vpack.c.bf16 %v354_v23, %v353_v22  ;;  %vm458_vm2 = vcmp.eq.s32.totalorder %v453_v28, %v682_v26  ;;  %v680_v31 = vld [vmem:[%s1421_s5] ss:$0 sm:$0xff]  ;;  %v572_v23 = vld [vmem:[#allocation12 + $0x70] sm:$0xff] }
  0x6e   :  { %949 = vmatprep.subr.bf16.mxu0 %v948_v30  ;;  %v683_v29 = vsel %vm458_vm2, 1.0, %v1220_v27  ;;  %v561_v6 = vld [vmem:[#allocation12 + $0x18] sm:$0xff] }
  0x70   :  { %979 = vmatpush3.bf16.msra.mxu1 %v976_v35 }
  0x71   :  { %951 = vmatpush3.bf16.msra.mxu0 %v948_v30  ;;  %981 = vmatprep.subr.bf16.mxu1 %v980_v41  ;;  %v539_v30 = vsel %vm462_vm1, %v683_v29, 0.0 }
  0x72   :  { %953 = vmatprep.subr.bf16.mxu0 %v952_v36  ;;  %540 = vadd.xlane.f32.xlu0 %v539_v30 }
  0x74   :  { %983 = vmatpush3.bf16.msra.mxu1 %v980_v41 }
  0x75   :  { %955 = vmatpush3.bf16.msra.mxu0 %v952_v36  ;;  %985 = vmatprep.subr.bf16.mxu1 %v984_v45 }
  0x76   :  { %957 = vmatprep.subr.bf16.mxu0 %v956_v42 }
  0x78   :  { %987 = vmatpush3.bf16.msra.mxu1 %v984_v45 }
  0x79   :  { %959 = vmatpush3.bf16.msra.mxu0 %v956_v42  ;;  %989 = vmatprep.subr.bf16.mxu1 %v988_v51 }
  0x7a   :  { %993 = vmatprep.subr.bf16.mxu0 %v992_v55 }
  0x7c   :  { %801 = vmatmul.mubr.f32.vlgmr.msra.gmra.mrb[0].mxu0 %v112_v46  ;;  %991 = vmatpush3.bf16.msra.mxu1 %v988_v51  ;;  %v538_v46 = vld [vmem:[#allocation3] sm:$0xff] }
  0x7d   :  { %803 = vmatprep.mubr.f32.mxu0 %v113_v47  ;;  %995 = vmatpush3.bf16.msra.mxu0 %v992_v55  ;;  %v681_v51 = vld [vmem:[%s1423_s7] ss:$0 sm:$0xff] }
  0x7e   :  { %997 = vmatprep.subr.bf16.mxu0 %v996_v57  ;;  %1024 = vmatprep.subr.bf16.mxu1 %v1221_v44 }
  0x80   :  { %804 = vmatmul.mubr.f32.gmra.mrb[2].mxu0 %v114_v48  ;;  %v1223_v48 = vmov 0  }
  0x81   :  { %999 = vmatpush3.bf16.msra.mxu0 %v996_v57  ;;  %1066 = vset.pattern.permute.xlu0 %v1223_v48 }
  0x82   :  { %1001 = vmatprep.subr.bf16.mxu0 %v1000_v60 }
  0x85   :  { %1003 = vmatpush3.bf16.msra.mxu0 %v1000_v60 }
  0x86   :  { %1005 = vmatprep.subr.bf16.mxu0 %v1004_v63 }
  0x89   :  { %1007 = vmatpush3.bf16.msra.mxu0 %v1004_v63 }
  0x8a   :  { %1009 = vmatprep.subr.bf16.mxu0 %v1008_v2 }
  0x8d   :  { %1011 = vmatpush3.bf16.msra.mxu0 %v1008_v2  ;;  %v559_v2 = vld [vmem:[#allocation12 + $0x8] sm:$0xff] }
  0x8e   :  { %1013 = vmatprep.subr.bf16.mxu0 %v1012_v5  ;;  %v1031_v4 = vpack.c.bf16 %v559_v2, %v558_v1 }
  0x91   :  { %1015 = vmatpush3.bf16.msra.mxu0 %v1012_v5  ;;  %v560_v5 = vld [vmem:[#allocation12 + $0x10] sm:$0xff] }
  0x92   :  { %1017 = vmatprep.subr.bf16.mxu0 %v1016_v8  ;;  %v1034_v7 = vpack.c.bf16 %v561_v6, %v560_v5 }
  0x95   :  { %1019 = vmatpush3.bf16.msra.mxu0 %v1016_v8  ;;  %v562_v8 = vld [vmem:[#allocation12 + $0x20] sm:$0xff] }
  0x96   :  { %1021 = vmatprep.subr.bf16.mxu0 %v1020_v24 }
  0x99   :  { %1023 = vmatpush3.bf16.msra.mxu0 %v1020_v24  ;;  %v573_v24 = vld [vmem:[#allocation12 + $0x78] sm:$0xff] }
  0x9a   :  { %v1052_v25 = vpack.c.bf16 %v573_v24, %v572_v23 }
  0xff   :  { %v541_v45 = vpop.xlane.xlu0 %540 }
 0x100   :  { %v542_v47 = vadd.f32 %v541_v45, %v538_v46 }
 0x102   :  { %544 = vst.msk [vmem:[#allocation3] sm:$0xff] %vm109_vm0, %v542_v47 }
 0x109   :  { %v548_v49 = vld [vmem:[#allocation3] sm:$0xff] }
 0x10a   :  { %v549_v50 = vmax.f32 %v548_v49, 1.0 }
 0x10c   :  { %553 = vperm.xlu0 %1066, %v549_v50  }
 0x14f   :  { %v802_v10 = vpop.f32.mrb[0].mxu0 }
 0x150   :  { %v210_v11 = vadd.f32 %v802_v10, %v679_v9  ;;  %v204_v12 = vpop.f32.mrb[1].mxu0 }
 0x151   :  { %v205_v13 = vadd.f32 %v679_v9, %v204_v12  ;;  %v565_v12 = vld [vmem:[#allocation12 + $0x38] sm:$0xff] }
 0x152   :  { %v224_v16 = vmax.f32 %v210_v11, 0.0  ;;  %v564_v11 = vld [vmem:[#allocation12 + $0x30] sm:$0xff] }
 0x153   :  { %v805_v14 = vpop.f32.mrb[2].mxu0  ;;  %v223_v15 = vmax.f32 %v205_v13, 0.0  ;;  %v1040_v13 = vpack.c.bf16 %v565_v12, %v564_v11 }
 0x154   :  { %v220_v17 = vadd.f32 %v805_v14, %v679_v9  ;;  %v214_v18 = vpop.f32.mrb[3].mxu0  ;;  %v566_v14 = vld [vmem:[#allocation12 + $0x40] sm:$0xff] }
 0x155   :  { %v215_v19 = vadd.f32 %v679_v9, %v214_v18  ;;  %838 = vmatprep.mubr.f32.mxu1 %v223_v15  ;;  %v563_v9 = vld [vmem:[#allocation12 + $0x28] sm:$0xff]  ;;  %v569_v18 = vld [vmem:[#allocation12 + $0x58] sm:$0xff] }
 0x156   :  { %839 = vmatmul.mubr.f32.vlgmr.msra.gmra.mrb[0].mxu1 %v224_v16  ;;  %v226_v21 = vmax.f32 %v220_v17, 0.0  ;;  %v1037_v10 = vpack.c.bf16 %v563_v9, %v562_v8  ;;  %v567_v15 = vld [vmem:[#allocation12 + $0x48] sm:$0xff]  ;;  %v568_v17 = vld [vmem:[#allocation12 + $0x50] sm:$0xff] }
 0x157   :  { %v225_v20 = vmax.f32 %v215_v19, 0.0  ;;  %v1043_v16 = vpack.c.bf16 %v567_v15, %v566_v14  ;;  %v1046_v19 = vpack.c.bf16 %v569_v18, %v568_v17 }
 0x159   :  { %841 = vmatprep.mubr.f32.mxu1 %v225_v20  ;;  %v570_v20 = vld [vmem:[#allocation12 + $0x60] sm:$0xff] }
 0x15a   :  { %842 = vmatmul.mubr.f32.gmra.mrb[2].mxu1 %v226_v21  ;;  %v571_v21 = vld [vmem:[#allocation12 + $0x68] sm:$0xff] }
 0x15b   :  { %890 = vmatprep.mubr.msk.f32.mxu1 %vm1222_vm3, %v1220_v27  ;;  %v1049_v22 = vpack.c.bf16 %v571_v21, %v570_v20 }
 0x18b   :  { %v554_v26 = vpop.permute.xlu0 %553 }
 0x18c   :  { %1067 = vrcp.f32 %v554_v26 }
 0x229   :  { %v840_v32 = vpop.f32.mrb[0].mxu1 }
 0x22a   :  { %v322_v33 = vadd.f32 %v840_v32, %v680_v31  ;;  %v316_v34 = vpop.f32.mrb[1].mxu1 }
 0x22b   :  { %v317_v35 = vadd.f32 %v680_v31, %v316_v34 }
 0x22c   :  { %v336_v38 = vmax.f32 %v322_v33, 0.0 }
 0x22d   :  { %v335_v36 = vmax.f32 %v317_v35, 0.0  ;;  %v843_v37 = vpop.f32.mrb[2].mxu1 }
 0x22e   :  { %v332_v39 = vadd.f32 %v843_v37, %v680_v31  ;;  %v326_v40 = vpop.f32.mrb[3].mxu1 }
 0x22f   :  { %v327_v41 = vadd.f32 %v680_v31, %v326_v40  ;;  %876 = vmatprep.mubr.f32.mxu0 %v335_v36  ;;  %v685_v31 = vld [vmem:[%s1425_s9] ss:$0 sm:$0xff]  ;;  %s1183_s9 = scalar_lea.vmem %s669_s2, 128 }
 0x230   :  { %877 = vmatmul.mubr.f32.vlgmr.msra.gmra.mrb[4].mxu0 %v336_v38  ;;  %v338_v43 = vmax.f32 %v332_v39, 0.0  ;;  %p1184_p12 = scmp.ne.s32.totalorder %s669_s2, %s1183_s9  ;;  %p1189_p0 = scmp.lt.s32.totalorder %s1183_s9, %s1183_s9 }
 0x231   :  { %v337_v42 = vmax.f32 %v327_v41, 0.0 }
 0x232   :  { %p1190_p1 = por %p1189_p0, %p1188_p13 }
 0x233   :  { %879 = vmatprep.mubr.f32.mxu0 %v337_v42 }
 0x234   :  { %880 = vmatmul.mubr.f32.gmra.mrb[6].mxu0 %v338_v43  ;;  %p1191_p2 = pnand %p1190_p1, %p1184_p12 }
 0x303   :  { %v878_v52 = vpop.f32.mrb[4].mxu0 }
 0x304   :  { %v434_v53 = vadd.f32 %v878_v52, %v681_v51  ;;  %v428_v54 = vpop.f32.mrb[5].mxu0 }
 0x305   :  { %v429_v55 = vadd.f32 %v681_v51, %v428_v54 }
 0x306   :  { %v448_v56 = vmax.f32 %v434_v53, 0.0 }
 0x307   :  { %v447_v57 = vmax.f32 %v429_v55, 0.0  ;;  %v881_v58 = vpop.f32.mrb[6].mxu0 }
 0x308   :  { %v444_v59 = vadd.f32 %v881_v58, %v681_v51  ;;  %v438_v60 = vpop.f32.mrb[7].mxu0 }
 0x309   :  { %v1025_v61 = vpack.c.bf16 %v448_v56, %v447_v57  ;;  %v439_v62 = vadd.f32 %v681_v51, %v438_v60 }
 0x30a   :  { %v450_v63 = vmax.f32 %v444_v59, 0.0 }
 0x30b   :  { %v449_v0 = vmax.f32 %v439_v62, 0.0  ;;  %1026 = vmatpush3.bf16.msra.mxu1 %v1025_v61 }
 0x30c   :  { %1027 = vmatprep.subr.bf16.mxu1 %v1221_v44 }
 0x30d   :  { %v1028_v3 = vpack.c.bf16 %v450_v63, %v449_v0 }
 0x30f   :  { %1029 = vmatpush3.bf16.msra.mxu1 %v1028_v3 }
 0x310   :  { %1030 = vmatprep.subr.bf16.mxu1 %v1221_v44 }
 0x312   :  { %891 = vmatmul.mubr.msk.f32.vlgmr.msra.gmra.mrb[4].mxu1 %vm462_vm1, %v683_v29 }
 0x313   :  { %1032 = vmatpush3.bf16.msra.mxu1 %v1031_v4  ;;  %925 = vmatprep.mubr.msk.f32.mxu1 %vm1222_vm3, %v1220_v27  ;;  %v1068_v27 = vpop.eup %1067 }
 0x314   :  { %1033 = vmatprep.subr.bf16.mxu1 %v1221_v44 }
 0x317   :  { %1035 = vmatpush3.bf16.msra.mxu1 %v1034_v7 }
 0x318   :  { %1036 = vmatprep.subr.bf16.mxu1 %v1221_v44 }
 0x31b   :  { %1038 = vmatpush3.bf16.msra.mxu1 %v1037_v10 }
 0x31c   :  { %1039 = vmatprep.subr.bf16.mxu1 %v1221_v44 }
 0x31f   :  { %1041 = vmatpush3.bf16.msra.mxu1 %v1040_v13 }
 0x320   :  { %1042 = vmatprep.subr.bf16.mxu1 %v1221_v44 }
 0x323   :  { %1044 = vmatpush3.bf16.msra.mxu1 %v1043_v16 }
 0x324   :  { %1045 = vmatprep.subr.bf16.mxu1 %v1221_v44 }
 0x327   :  { %1047 = vmatpush3.bf16.msra.mxu1 %v1046_v19 }
 0x328   :  { %1048 = vmatprep.subr.bf16.mxu1 %v1221_v44 }
 0x32b   :  { %1050 = vmatpush3.bf16.msra.mxu1 %v1049_v22 }
 0x32c   :  { %1051 = vmatprep.subr.bf16.mxu1 %v1221_v44 }
 0x32f   :  { %1053 = vmatpush3.bf16.msra.mxu1 %v1052_v25 }
 0x3e5   :  { %v532_v28 = vpop.f32.mrb[4].mxu1 }
 0x3e6   :  { %v557_v29 = vmul.f32 %v1068_v27, %v532_v28  ;;  %v892_v30 = vpop.f32.mrb[5].mxu1 }
 0x3e8   :  { %926 = vmatmul.mubr.f32.vlgmr.msra.gmra.mrb[6].mxu1 %v557_v29 }
 0x4bb   :  { %v647_v32 = vpop.f32.mrb[6].mxu1 }
 0x4bc   :  { %v648_v33 = vadd.f32 %v685_v31, %v647_v32  ;;  %v927_v34 = vpop.f32.mrb[7].mxu1 }
 0x4be   :  { %651 = vmax.xlane.f32.xlu1 %v648_v33 }
 0x54b   :  { %v652_v35 = vpop.xlane.xlu1 %651 }
 0x54c   :  { %v653_v36 = vsub.f32 %v648_v33, %v652_v35 }
 0x54e   :  { %v654_v37 = vmul.f32 1.442695, %v653_v36 }
 0x550   :  { %1069 = vpow2.f32 %v654_v37 }
 0x55a   :  { %v1070_v38 = vpop.eup %1069 }
 0x55b   :  { %656 = vadd.xlane.f32.xlu1 %v1070_v38 }
 0x5e8   :  { %v657_v39 = vpop.xlane.xlu1 %656 }
 0x5e9   :  { %1071 = vlog2.f32 %v657_v39 }
 0x5f3   :  { %v1072_v40 = vpop.eup %1071 }
 0x5f4   :  { %v659_v41 = vmul.f32 0.6931472, %v1072_v40 }
 0x5f6   :  { %v660_v42 = vsub.f32 %v653_v36, %v659_v41 }
 0x5f8   :  { %661 = vst [vmem:[#allocation13] sm:$0xff] %v660_v42 }
 0x5f9   :  { %1194 = shalt.err (!%p1191_p2)
}
 0x5fa   :  { %s1195_s21 = scalar_lea.hbm %s1426_s10, 128 }
 0x5fb   :  { %p1196_p3 = scmp.ne.s32.totalorder %s1426_s10, %s1195_s21  ;;  %p1199_p4 = scmp.lt.u32.totalorder %s1195_s21, %s1426_s10 }
 0x5fd   :  { %p1201_p5 = pnand %p1199_p4, %p1196_p3 }
 0x5ff   :  { %1204 = shalt.err (!%p1201_p5)
}
 0x600   :  { %671 = dma.vmem_to_hbm [thread:$0]  %s669_s2, 128, %s1426_s10, [#allocation6]  }
 0x601   :  { %1211 = dma.done.wait [#allocation6], 128  }
 0x602   :  { %1212 = vsyncadd [#allocation6], 4294967168 }
 0x603   :  { %675 = vsyncpa [#allocation5], 1 }
 0x604   :  { %676 = vsyncpa [#allocation8], 1 }
 0x605   :  { %677 = vsyncpa [#allocation11], 1 }
 0x606   :  { %678 = vsyncpa [#allocation6], 1 }

</bundles_post_ra>
